<compile_context>
chip_gen: v5e
topology: v5e:2x2
jax: 0.10.0
libtpu: 0.0.40
codegen_flags: <defaults>
</compile_context>

<pallas_src>
import jax
import jax.numpy as jnp
from jax.experimental import pallas as pl
from jax.experimental.pallas import tpu as pltpu


def attn_pooling_kernel(h_ref, w1t_ref, b1_ref, w2t_ref, b2_ref, out_ref):
    TB, N, F = h_ref.shape

    h = h_ref[...]                                        # [TB, N, F]
    h2d = h.reshape(TB * N, F)                            # free collapse when N % 8 == 0

    # fc1 + tanh (one MXU call for all TB*N nodes)
    z1 = jnp.tanh(
        jnp.dot(h2d, w1t_ref[...], preferred_element_type=jnp.float32)
        + b1_ref[...]                                     # [1, D] broadcasts once
    )                                                     # [TB*N, D]

    # fc2 -> per-head scores
    z2 = (jnp.dot(z1, w2t_ref[...], preferred_element_type=jnp.float32)
          + b2_ref[...])                                  # [TB*N, H]
    z2 = z2.reshape(TB, N, -1)

    # softmax over nodes, per graph / per head  == dgl.softmax_nodes
    m = jnp.max(z2, axis=1, keepdims=True)                # [TB, 1, H]
    e = jnp.exp(z2 - m)                                   # [TB, N, H]
    denom = jnp.sum(e, axis=1, keepdims=True)             # [TB, 1, H]
    attn = e / denom                                      # exact divide (1e-5 contract)

    # mean over heads of per-head weighted node sums
    #   == weighted sum of h with per-node weight mean_i attn[:, :, i]
    w = jnp.mean(attn, axis=2, keepdims=True)             # [TB, N, 1]
    pooled = jnp.sum(w * h, axis=1)                       # [TB, F]  (VPU + sublane reduce)

    out_ref[...] = pooled.astype(out_ref.dtype)


def _vmem_caps():
    """(block budget, vmem_limit_bytes) — generation-aware, v7x-safe fallback."""
    try:
        phys = pltpu.get_tpu_info().vmem_capacity_bytes
    except Exception:
        phys = 64 << 20            # assume v7x (smallest per-TC VMEM)
    budget = int(phys * 0.6)       # headroom for runtime / pipeline slack
    limit = min(int(phys * 0.75), 96 << 20)
    return budget, limit


def _choose_tb(B, N, F, budget_bytes):
    """Graphs per grid step.

    Accounts for lane-padded intermediates (z1/z2/e/attn pad D,H up to 128
    lanes) plus the double-buffered h block.  Prefers divisors of B (no batch
    padding copy) that keep the (TB, F) output block sublane-legal
    (TB % 8 == 0 or TB == B) and leave >= 2 grid steps when possible so v7x
    can shard the parallel grid axis across both TensorCores.
    """
    lane = 128
    per_graph = (2 * N * F          # h block, double-buffered
                 + 4 * N * lane     # z1, z2, e, attn (lane-padded to 128)
                 + N * F            # w * h product before the node reduction
                 ) * 4              # f32 bytes
    cap = max(1, budget_bytes // per_graph)

    cands = [t for t in range(8, min(B, cap) + 1, 8) if B % t == 0]
    if B <= cap:
        cands.append(B)             # whole batch in one grid step is also legal
    if cands:
        multi = [t for t in cands if B // t >= 2]
        return max(multi) if multi else max(cands)
    # No divisor of B fits the budget: tile by 8, wrapper pads the batch (rare).
    return max(8, (cap // 8) * 8)


def attn_pooling(h, w1, b1, w2, b2):
    """h: [B, N, F]. w1: [D, F], b1: [D], w2: [H, D], b2: [H]. Returns [B, F] f32."""
    h = jnp.asarray(h, jnp.float32)
    B, N, F = h.shape
    D = w1.shape[0]
    H = w2.shape[0]

    w1t = jnp.asarray(w1, jnp.float32).T                  # [F, D]
    w2t = jnp.asarray(w2, jnp.float32).T                  # [D, H]
    b1r = jnp.asarray(b1, jnp.float32).reshape(1, D)
    b2r = jnp.asarray(b2, jnp.float32).reshape(1, H)

    budget, vmem_limit = _vmem_caps()
    TB = _choose_tb(B, N, F, budget)

    if B % TB == 0:
        h_in, Bp = h, B
    else:
        # Rare fallback: no divisor of B fit the VMEM budget.
        # TODO(synk): replace with a masked tail write to avoid this HBM copy.
        Bp = pl.cdiv(B, TB) * TB
        h_in = jnp.concatenate(
            [h, jnp.zeros((Bp - B, N, F), jnp.float32)], axis=0)

    out = pl.pallas_call(
        attn_pooling_kernel,
        out_shape=jax.ShapeDtypeStruct((Bp, F), jnp.float32),
        grid_spec=pltpu.PrefetchScalarGridSpec(
            num_scalar_prefetch=0,
            grid=(Bp // TB,),
            in_specs=[
                pl.BlockSpec((TB, N, F), lambda b: (b, 0, 0)),
                pl.BlockSpec((F, D), lambda b: (0, 0)),    # resident weights
                pl.BlockSpec((1, D), lambda b: (0, 0)),
                pl.BlockSpec((D, H), lambda b: (0, 0)),
                pl.BlockSpec((1, H), lambda b: (0, 0)),
            ],
            out_specs=pl.BlockSpec((TB, F), lambda b: (b, 0)),
        ),
        compiler_params=pltpu.CompilerParams(
            dimension_semantics=("parallel",),
            vmem_limit_bytes=vmem_limit),
    )(h_in, w1t, b1r, w2t, b2r)

    return out[:B]


def attn_pooling_ref(h, w1, b1, w2, b2):
    # Pure-JAX reference mirroring the PyTorch/DGL forward (full-f32 matmuls).
    z1 = jnp.tanh(jnp.einsum("bnf,df->bnd", h, w1, precision="highest") + b1)
    z2 = jnp.einsum("bnd,hd->bnh", z1, w2, precision="highest") + b2
    attn = jax.nn.softmax(z2, axis=1)                      # over nodes
    per_head = jnp.einsum("bnh,bnf->bhf", attn, h, precision="highest")
    return jnp.mean(per_head, axis=1)                      # mean over heads


if __name__ == "__main__":
    B, N = 2, 16
    in_features, dense_features, n_heads = 32, 16, 4

    key = jax.random.PRNGKey(0)
    k_h, k_w1, k_b1, k_w2, k_b2 = jax.random.split(key, 5)

    h = jax.random.normal(k_h, (B, N, in_features), dtype=jnp.float32)

    # Deterministic nn.Linear-style init (uniform +-1/sqrt(fan_in)).
    lim1 = 1.0 / (in_features ** 0.5)
    w1 = jax.random.uniform(k_w1, (dense_features, in_features),
                            minval=-lim1, maxval=lim1, dtype=jnp.float32)
    b1 = jax.random.uniform(k_b1, (dense_features,),
                            minval=-lim1, maxval=lim1, dtype=jnp.float32)
    lim2 = 1.0 / (dense_features ** 0.5)
    w2 = jax.random.uniform(k_w2, (n_heads, dense_features),
                            minval=-lim2, maxval=lim2, dtype=jnp.float32)
    b2 = jax.random.uniform(k_b2, (n_heads,),
                            minval=-lim2, maxval=lim2, dtype=jnp.float32)

    out = attn_pooling(h, w1, b1, w2, b2)
    out = jax.block_until_ready(out)

    ref = attn_pooling_ref(h, w1, b1, w2, b2)
    assert out.shape == (B, in_features)
    assert jnp.allclose(out, ref, atol=1e-5, rtol=1e-5), "mismatch vs reference"

    print("KERNEL_OK")
</pallas_src>

<mosaic_0001>
module attributes {stable_mosaic.version = 11 : i64} {
  func.func @attn_pooling_kernel(%arg0: i32, %arg1: memref<2x16x32xf32, #tpu.memory_space<vmem>>, %arg2: memref<32x16xf32, #tpu.memory_space<vmem>>, %arg3: memref<1x16xf32, #tpu.memory_space<vmem>>, %arg4: memref<16x4xf32, #tpu.memory_space<vmem>>, %arg5: memref<1x4xf32, #tpu.memory_space<vmem>>, %arg6: memref<2x32xf32, #tpu.memory_space<vmem>>) attributes {dimension_semantics = [#tpu.dimension_semantics<parallel>], iteration_bounds = array<i64: 1>, scalar_prefetch = 0 : i64, scratch_operands = 0 : i64, tpu.core_type = #tpu.core_type<tc>, window_params = [{transform_indices = @transform_0, window_bounds = array<i64: 2, 16, 32>}, {pipeline_mode = #tpu.pipeline_mode<synchronous>, transform_indices = @transform_1, window_bounds = array<i64: 32, 16>}, {pipeline_mode = #tpu.pipeline_mode<synchronous>, transform_indices = @transform_2, window_bounds = array<i64: 1, 16>}, {pipeline_mode = #tpu.pipeline_mode<synchronous>, transform_indices = @transform_3, window_bounds = array<i64: 16, 4>}, {pipeline_mode = #tpu.pipeline_mode<synchronous>, transform_indices = @transform_4, window_bounds = array<i64: 1, 4>}, {transform_indices = @transform_5, window_bounds = array<i64: 2, 32>}]} {
    %c0 = arith.constant 0 : index
    %c0_0 = arith.constant 0 : index
    %c0_1 = arith.constant 0 : index
    %0 = vector.load %arg1[%c0, %c0_0, %c0_1] : memref<2x16x32xf32, #tpu.memory_space<vmem>>, vector<2x16x32xf32>
    %1 = vector.shape_cast %0 : vector<2x16x32xf32> to vector<32x32xf32>
    %c0_2 = arith.constant 0 : index
    %c0_3 = arith.constant 0 : index
    %2 = vector.load %arg2[%c0_2, %c0_3] : memref<32x16xf32, #tpu.memory_space<vmem>>, vector<32x16xf32>
    %cst = arith.constant dense<0.000000e+00> : vector<32x16xf32>
    %3 = tpu.matmul %1, %2, %cst {dimension_numbers = #tpu.dot_dimension_numbers<[1], [0], [0], [1], [0, 0, 1, 1], [], []>} : vector<32x32xf32>, vector<32x16xf32>, vector<32x16xf32> -> vector<32x16xf32>
    %c0_4 = arith.constant 0 : index
    %c0_5 = arith.constant 0 : index
    %4 = vector.load %arg3[%c0_4, %c0_5] : memref<1x16xf32, #tpu.memory_space<vmem>>, vector<1x16xf32>
    %5 = vector.broadcast %4 : vector<1x16xf32> to vector<32x16xf32>
    %6 = arith.addf %3, %5 : vector<32x16xf32>
    %7 = math.tanh %6 : vector<32x16xf32>
    %c0_6 = arith.constant 0 : index
    %c0_7 = arith.constant 0 : index
    %8 = vector.load %arg4[%c0_6, %c0_7] : memref<16x4xf32, #tpu.memory_space<vmem>>, vector<16x4xf32>
    %cst_8 = arith.constant dense<0.000000e+00> : vector<32x4xf32>
    %9 = tpu.matmul %7, %8, %cst_8 {dimension_numbers = #tpu.dot_dimension_numbers<[1], [0], [0], [1], [0, 0, 1, 1], [], []>} : vector<32x16xf32>, vector<16x4xf32>, vector<32x4xf32> -> vector<32x4xf32>
    %c0_9 = arith.constant 0 : index
    %c0_10 = arith.constant 0 : index
    %10 = vector.load %arg5[%c0_9, %c0_10] : memref<1x4xf32, #tpu.memory_space<vmem>>, vector<1x4xf32>
    %11 = vector.broadcast %10 : vector<1x4xf32> to vector<32x4xf32>
    %12 = arith.addf %9, %11 : vector<32x4xf32>
    %13 = vector.shape_cast %12 : vector<32x4xf32> to vector<2x16x4xf32>
    %cst_11 = arith.constant dense<0xFF800000> : vector<2x4xf32>
    %14 = vector.multi_reduction <maximumf>, %13, %cst_11 [1] : vector<2x16x4xf32> to vector<2x4xf32>
    %15 = vector.shape_cast %14 : vector<2x4xf32> to vector<2x1x4xf32>
    %16 = vector.broadcast %15 : vector<2x1x4xf32> to vector<2x16x4xf32>
    %17 = arith.subf %13, %16 : vector<2x16x4xf32>
    %18 = math.exp %17 : vector<2x16x4xf32>
    %cst_12 = arith.constant dense<0.000000e+00> : vector<2x4xf32>
    %19 = vector.multi_reduction <add>, %18, %cst_12 [1] : vector<2x16x4xf32> to vector<2x4xf32>
    %20 = vector.shape_cast %19 : vector<2x4xf32> to vector<2x1x4xf32>
    %21 = vector.broadcast %20 : vector<2x1x4xf32> to vector<2x16x4xf32>
    %22 = arith.divf %18, %21 : vector<2x16x4xf32>
    %cst_13 = arith.constant dense<0.000000e+00> : vector<2x16xf32>
    %23 = vector.multi_reduction <add>, %22, %cst_13 [2] : vector<2x16x4xf32> to vector<2x16xf32>
    %24 = vector.shape_cast %23 : vector<2x16xf32> to vector<2x16x1xf32>
    %cst_14 = arith.constant 4.000000e+00 : f32
    %25 = vector.broadcast %cst_14 : f32 to vector<2x16x1xf32>
    %26 = arith.divf %24, %25 : vector<2x16x1xf32>
    %27 = vector.broadcast %26 : vector<2x16x1xf32> to vector<2x16x32xf32>
    %28 = arith.mulf %27, %0 : vector<2x16x32xf32>
    %cst_15 = arith.constant dense<0.000000e+00> : vector<2x32xf32>
    %29 = vector.multi_reduction <add>, %28, %cst_15 [1] : vector<2x16x32xf32> to vector<2x32xf32>
    %c0_16 = arith.constant 0 : index
    %c0_17 = arith.constant 0 : index
    %30 = vector.load %arg6[%c0_16, %c0_17] : memref<2x32xf32, #tpu.memory_space<vmem>>, vector<2x32xf32>
    tpu.vector_store %arg6[%c0_16, %c0_17], %29 {strides = array<i32>} : memref<2x32xf32, #tpu.memory_space<vmem>>, vector<2x32xf32>,
    return
  }
  func.func @transform_0(%arg0: i32) -> (i32, i32, i32) {
    %c0_i32 = arith.constant 0 : i32
    %c0_i32_0 = arith.constant 0 : i32
    %c0_i32_1 = arith.constant 0 : i32
    return %arg0, %c0_i32, %c0_i32_0 : i32, i32, i32
  }
  func.func @transform_1(%arg0: i32) -> (i32, i32) {
    %c0_i32 = arith.constant 0 : i32
    %c0_i32_0 = arith.constant 0 : i32
    %c0_i32_1 = arith.constant 0 : i32
    return %c0_i32, %c0_i32_0 : i32, i32
  }
  func.func @transform_2(%arg0: i32) -> (i32, i32) {
    %c0_i32 = arith.constant 0 : i32
    %c0_i32_0 = arith.constant 0 : i32
    %c0_i32_1 = arith.constant 0 : i32
    return %c0_i32, %c0_i32_0 : i32, i32
  }
  func.func @transform_3(%arg0: i32) -> (i32, i32) {
    %c0_i32 = arith.constant 0 : i32
    %c0_i32_0 = arith.constant 0 : i32
    %c0_i32_1 = arith.constant 0 : i32
    return %c0_i32, %c0_i32_0 : i32, i32
  }
  func.func @transform_4(%arg0: i32) -> (i32, i32) {
    %c0_i32 = arith.constant 0 : i32
    %c0_i32_0 = arith.constant 0 : i32
    %c0_i32_1 = arith.constant 0 : i32
    return %c0_i32, %c0_i32_0 : i32, i32
  }
  func.func @transform_5(%arg0: i32) -> (i32, i32) {
    %c0_i32 = arith.constant 0 : i32
    %c0_i32_0 = arith.constant 0 : i32
    return %arg0, %c0_i32 : i32, i32
  }
}

</mosaic_0001>

<bundles_post_ra>
// kernel: tpu_custom_call.1
= control target key start
LH: loop header
LB: loop body
LE: loop exit
PB: predicated region body
PF: predicated region fallthrough
CT: control target
= control target key end

     0   :  { %s453_s0 = inlined_call_operand.vmem [shape: f32[2,16,32], index: 0, kind: input, shape index: {}]   ;;  %s454_s1 = inlined_call_operand.vmem [shape: f32[32,16], index: 1, kind: input, shape index: {}]   ;;  %s455_s2 = inlined_call_operand.vmem [shape: f32[1,16], index: 2, kind: input, shape index: {}]   ;;  %s456_s3 = inlined_call_operand.vmem [shape: f32[16,4], index: 3, kind: input, shape index: {}]   ;;  %s457_s4 = inlined_call_operand.vmem [shape: f32[1,4], index: 4, kind: input, shape index: {}]   ;;  %s458_s5 = inlined_call_operand.hbm [shape: f32[2,32], index: 5, kind: output, shape index: {}]  }
   0x1   :  { %v28_v0 = vld [vmem:[%s454_s1 + $0x18] sm:$0xff]  ;;  %v27_v1 = vld [vmem:[%s454_s1 + $0x10] sm:$0xff]  ;;  %v26_v2 = vld [vmem:[%s454_s1 + $0x8] sm:$0xff] }
   0x2   :  { %58 = vmatpush.msra.mxu0 %v28_v0  ;;  %284 = vmatpush.msra.mxu2 %v28_v0 }
   0x4   :  { %59 = vmatpush.msra.mxu0 %v27_v1  ;;  %285 = vmatpush.msra.mxu2 %v27_v1 }
   0x5   :  { %10 = vsyncpa [#allocation3], 0  ;;  %v25_v3 = vld [vmem:[%s454_s1] sm:$0xff]  ;;  %vm33_vm0 = vcmask 261120   ;;  %v394_v5 = vld [vmem:[%s453_s0 + $0x10] sm:$0xff]  ;;  %vm85_vm1 = vcmask 130048  }
   0x6   :  { %60 = vmatpush.msra.mxu0 %v26_v2  ;;  %v389_v4 = vld [vmem:[%s453_s0] sm:$0xff]  ;;  %286 = vmatpush.msra.mxu2 %v26_v2  ;;  %v403_v6 = vld [vmem:[%s453_s0 + $0x8] sm:$0xff]  ;;  %v408_v7 = vld [vmem:[%s453_s0 + $0x18] sm:$0xff]  ;;  %vm127_vm2 = vcmask 31744   ;;  %s267_s16 = sshll.u32 %s458_s5, 4  ;;  %vm255_vm12 = vcmask 1041409   ;;  %s268_s16 = int_to_ptr.hbm [resolvable:$true] %s267_s16 }
   0x7   :  { %v80_v8 = vld [vmem:[%s456_s3 + $0x8] sm:$0xff]  ;;  %v79_v9 = vld [vmem:[%s456_s3] sm:$0xff]  ;;  %vm258_vm13 = vcmask 254976  }
   0x8   :  { %61 = vmatpush.msra.mxu0 %v25_v3  ;;  %287 = vmatpush.msra.mxu2 %v25_v3  ;;  %v292_v10 = vld [vmem:[%s455_s2] ss:$0 sm:$0xff] }
   0x9   :  { %276 = vmatmul.msk.f32.vlgmr.msra.gmra.mxu0 %vm33_vm0, %v389_v4  ;;  %278 = vmatmul.msk.f32.vlgmr.msra.gmra.mxu2 %vm33_vm0, %v394_v5  ;;  %v293_v23 = vld [vmem:[%s457_s4] ss:$0 sm:$0xff]  ;;  %s343_s4 = smov [#allocation2]  }
   0xa   :  { %112 = vmatpush.msra.mxu1 %v80_v8  ;;  %288 = vmatpush.msra.mxu3 %v80_v8  ;;  %s265_s13 = sshll.u32 %s343_s4, 4  ;;  %s266_s13 = int_to_ptr.vmem [resolvable:$true] %s265_s13 }
   0xc   :  { %113 = vmatpush.msra.mxu1 %v79_v9  ;;  %289 = vmatpush.msra.mxu3 %v79_v9 }
  0x11   :  { %277 = vmatmul.msk.f32.gmra.mxu0 %vm33_vm0, %v403_v6  ;;  %279 = vmatmul.msk.f32.gmra.mxu2 %vm33_vm0, %v408_v7 }
  0x86   :  { %v63_v11 = vpop.f32.mrf.mxu0 }
  0x87   :  { %v64_v12 = vadd.f32 %v292_v10, %v63_v11 }
  0x89   :  { %294 = vtanh.f32 %v64_v12 }
  0x8c   :  { %v69_v14 = vpop.f32.mrf.mxu2 }
  0x8d   :  { %v70_v17 = vadd.f32 %v292_v10, %v69_v14 }
  0x8e   :  { %v66_v13 = vpop.f32.mrf.mxu0 }
  0x8f   :  { %v295_v15 = vpop.eup %294  ;;  %v67_v16 = vadd.f32 %v292_v10, %v66_v13 }
  0x90   :  { %280 = vmatmul.msk.f32.vlgmr.msra.gmra.mxu1 %vm85_vm1, %v295_v15 }
  0x91   :  { %296 = vtanh.f32 %v67_v16 }
  0x92   :  { %298 = vtanh.f32 %v70_v17 }
  0x94   :  { %v72_v19 = vpop.f32.mrf.mxu2 }
  0x95   :  { %v73_v20 = vadd.f32 %v292_v10, %v72_v19 }
  0x97   :  { %v297_v18 = vpop.eup %296  ;;  %300 = vtanh.f32 %v73_v20 }
  0x98   :  { %281 = vmatmul.msk.f32.vlgmr.msra.gmra.mxu3 %vm85_vm1, %v297_v18  ;;  %v299_v21 = vpop.eup %298 }
  0x9d   :  { %v301_v22 = vpop.eup %300 }
  0xa0   :  { %282 = vmatmul.msk.f32.gmra.mxu3 %vm85_vm1, %v299_v21 }
  0xa8   :  { %283 = vmatmul.msk.f32.gmra.mxu3 %vm85_vm1, %v301_v22 }
 0x10d   :  { %v115_v24 = vpop.f32.mrf.mxu1 }
 0x10e   :  { %v116_v25 = vadd.f32 %v293_v23, %v115_v24 }
 0x110   :  { %v128_v28 = vsel %vm127_vm2, %v116_v25, -inf }
 0x11b   :  { %v118_v26 = vpop.f32.mrf.mxu3 }
 0x11c   :  { %v119_v27 = vadd.f32 %v293_v23, %v118_v26 }
 0x11e   :  { %v129_v29 = vsel %vm127_vm2, %v119_v27, -inf }
 0x11f   :  { %v130_v30 = vmax.f32 %v128_v28, %v129_v29 }
 0x121   :  { %v131_v31 = vrot.slane %v130_v30, 4 }
 0x123   :  { %v132_v32 = vmax.f32 %v130_v30, %v131_v31  ;;  %v121_v33 = vpop.f32.mrf.mxu3 }
 0x124   :  { %v122_v37 = vadd.f32 %v293_v23, %v121_v33 }
 0x125   :  { %v133_v34 = vrot.slane %v132_v32, 2 }
 0x126   :  { %v137_v43 = vsel %vm127_vm2, %v122_v37, -inf }
 0x127   :  { %v134_v35 = vmax.f32 %v132_v32, %v133_v34 }
 0x129   :  { %v135_v36 = vrot.slane %v134_v35, 1 }
 0x12b   :  { %v136_v38 = vmax.f32 %v134_v35, %v135_v36  ;;  %v124_v39 = vpop.f32.mrf.mxu3 }
 0x12c   :  { %v125_v40 = vadd.f32 %v293_v23, %v124_v39 }
 0x12d   :  { %v146_v41 = vsub.f32 %v116_v25, %v136_v38  ;;  %v147_v42 = vsub.f32 %v119_v27, %v136_v38 }
 0x12e   :  { %v138_v44 = vsel %vm127_vm2, %v125_v40, -inf }
 0x12f   :  { %v150_v45 = vmul.f32 1.442695, %v146_v41  ;;  %v152_v46 = vmul.f32 1.442695, %v147_v42  ;;  %v139_v47 = vmax.f32 %v137_v43, %v138_v44 }
 0x131   :  { %302 = vpow2.f32 %v150_v45  ;;  %v140_v48 = vrot.slane %v139_v47, 4 }
 0x132   :  { %304 = vpow2.f32 %v152_v46 }
 0x133   :  { %v141_v49 = vmax.f32 %v139_v47, %v140_v48  ;;  %v342_v48 = vmov 4.0  }
 0x135   :  { %v142_v50 = vrot.slane %v141_v49, 2 }
 0x137   :  { %v303_v51 = vpop.eup %302  ;;  %v143_v52 = vmax.f32 %v141_v49, %v142_v50 }
 0x138   :  { %v305_v53 = vpop.eup %304  ;;  %v158_v54 = vsel %vm127_vm2, %v303_v51, 0.0 }
 0x139   :  { %v159_v55 = vsel %vm127_vm2, %v305_v53, 0.0  ;;  %v144_v56 = vrot.slane %v143_v52, 1 }
 0x13a   :  { %v160_v57 = vadd.f32 %v159_v55, %v158_v54 }
 0x13b   :  { %v145_v58 = vmax.f32 %v143_v52, %v144_v56 }
 0x13c   :  { %v161_v59 = vrot.slane %v160_v57, 4 }
 0x13d   :  { %v148_v60 = vsub.f32 %v122_v37, %v145_v58  ;;  %v149_v61 = vsub.f32 %v125_v40, %v145_v58 }
 0x13e   :  { %v162_v62 = vadd.f32 %v161_v59, %v160_v57 }
 0x13f   :  { %v154_v63 = vmul.f32 1.442695, %v148_v60  ;;  %v156_v0 = vmul.f32 1.442695, %v149_v61 }
 0x140   :  { %v163_v1 = vrot.slane %v162_v62, 2 }
 0x141   :  { %306 = vpow2.f32 %v154_v63 }
 0x142   :  { %v164_v2 = vadd.f32 %v163_v1, %v162_v62  ;;  %308 = vpow2.f32 %v156_v0 }
 0x144   :  { %v165_v3 = vrot.slane %v164_v2, 1 }
 0x146   :  { %v166_v8 = vadd.f32 %v165_v3, %v164_v2 }
 0x147   :  { %v307_v9 = vpop.eup %306 }
 0x148   :  { %v309_v10 = vpop.eup %308  ;;  %310 = vrcp.f32 %v166_v8  ;;  %v167_v11 = vsel %vm127_vm2, %v307_v9, 0.0  ;;  %v187_v21 = vand.u32 2147483648, %v166_v8  ;;  %v185_v23 = vand.u32 2147483647, %v166_v8 }
 0x149   :  { %v168_v12 = vsel %vm127_vm2, %v309_v10, 0.0  ;;  %vm181_vm4 = vweird.f32 %v166_v8 }
 0x14a   :  { %v169_v13 = vadd.f32 %v168_v12, %v167_v11  ;;  %v188_v27 = vor.u32 1.1754944e-38, %v187_v21  ;;  %vm186_vm6 = vcmp.eq.f32.partialorder %v185_v23, 8.507059e+37 }
 0x14c   :  { %v170_v14 = vrot.slane %v169_v13, 4 }
 0x14e   :  { %v311_v15 = vpop.eup %310  ;;  %v171_v16 = vadd.f32 %v170_v14, %v169_v13 }
 0x14f   :  { %v177_v17 = vmul.f32 %v311_v15, %v166_v8  ;;  %vm182_vm3 = vweird.f32 %v311_v15 }
 0x150   :  { %v172_v18 = vrot.slane %v171_v16, 2  ;;  %vm183_vm5 = vmor %vm181_vm4, %vm182_vm3 }
 0x151   :  { %v178_v19 = vsub.f32 1.0, %v177_v17 }
 0x152   :  { %v173_v20 = vadd.f32 %v172_v18, %v171_v16 }
 0x153   :  { %v179_v22 = vmul.f32 %v311_v15, %v178_v19 }
 0x154   :  { %v174_v24 = vrot.slane %v173_v20, 1 }
 0x155   :  { %v180_v25 = vadd.f32 %v311_v15, %v179_v22 }
 0x156   :  { %v175_v26 = vadd.f32 %v174_v24, %v173_v20 }
 0x157   :  { %v184_v28 = vsel %vm183_vm5, %v311_v15, %v180_v25 }
 0x158   :  { %312 = vrcp.f32 %v175_v26  ;;  %v189_v29 = vsel %vm186_vm6, %v188_v27, %v184_v28  ;;  %v203_v36 = vand.u32 2147483648, %v175_v26  ;;  %v201_v39 = vand.u32 2147483647, %v175_v26 }
 0x159   :  { %v190_v30 = vmul.f32 %v303_v51, %v189_v29  ;;  %v191_v33 = vmul.f32 %v305_v53, %v189_v29  ;;  %vm197_vm8 = vweird.f32 %v175_v26  ;;  %314 = vrcp.f32 %v342_v48 }
 0x15a   :  { %v204_v41 = vor.u32 1.1754944e-38, %v203_v36  ;;  %vm202_vm10 = vcmp.eq.f32.partialorder %v201_v39, 8.507059e+37 }
 0x15b   :  { %v208_v31 = vsel %vm127_vm2, %v190_v30, 0.0  ;;  %v211_v37 = vsel %vm127_vm2, %v191_v33, 0.0 }
 0x15c   :  { %209 = vadd.xlane.f32.xlu0 %v208_v31 }
 0x15e   :  { %v313_v32 = vpop.eup %312 }
 0x15f   :  { %v193_v34 = vmul.f32 %v313_v32, %v175_v26  ;;  %vm198_vm7 = vweird.f32 %v313_v32  ;;  %v315_v49 = vpop.eup %314 }
 0x160   :  { %vm199_vm9 = vmor %vm197_vm8, %vm198_vm7  ;;  %v221_v50 = vmul.f32 4.0, %v315_v49  ;;  %vm225_vm11 = vweird.f32 %v315_v49 }
 0x161   :  { %v194_v35 = vsub.f32 1.0, %v193_v34 }
 0x162   :  { %v222_v51 = vsub.f32 1.0, %v221_v50 }
 0x163   :  { %v195_v38 = vmul.f32 %v313_v32, %v194_v35 }
 0x164   :  { %212 = vadd.xlane.f32.xlu0 %v211_v37  ;;  %v223_v52 = vmul.f32 %v315_v49, %v222_v51 }
 0x165   :  { %v196_v40 = vadd.f32 %v313_v32, %v195_v38 }
 0x166   :  { %v224_v54 = vadd.f32 %v315_v49, %v223_v52 }
 0x167   :  { %v200_v42 = vsel %vm199_vm9, %v313_v32, %v196_v40 }
 0x168   :  { %v205_v43 = vsel %vm202_vm10, %v204_v41, %v200_v42  ;;  %v226_v55 = vsel %vm225_vm11, %v315_v49, %v224_v54 }
 0x169   :  { %v206_v44 = vmul.f32 %v307_v9, %v205_v43  ;;  %v207_v46 = vmul.f32 %v309_v10, %v205_v43 }
 0x16b   :  { %v214_v45 = vsel %vm127_vm2, %v206_v44, 0.0  ;;  %v217_v47 = vsel %vm127_vm2, %v207_v46, 0.0 }
 0x16c   :  { %215 = vadd.xlane.f32.xlu1 %v214_v45 }
 0x174   :  { %218 = vadd.xlane.f32.xlu1 %v217_v47 }
 0x1cf   :  { %v210_v53 = vpop.xlane.xlu0 %209 }
 0x1d0   :  { %v227_v57 = vmul.f32 %v226_v55, %v210_v53 }
 0x1d2   :  { %v231_v60 = vmul.f32 %v227_v57, %v389_v4 }
 0x1d4   :  { %v235_v63 = vsel %vm33_vm0, %v231_v60, 0.0 }
 0x1d7   :  { %v213_v56 = vpop.xlane.xlu0 %212 }
 0x1d8   :  { %v228_v58 = vmul.f32 %v226_v55, %v213_v56 }
 0x1da   :  { %v232_v59 = vmul.f32 %v228_v58, %v403_v6 }
 0x1dc   :  { %v236_v61 = vsel %vm33_vm0, %v232_v59, 0.0 }
 0x1dd   :  { %v237_v0 = vadd.f32 %v236_v61, %v235_v63 }
 0x1df   :  { %v216_v62 = vpop.xlane.xlu1 %215  ;;  %v238_v2 = vrot.slane %v237_v0, 4 }
 0x1e0   :  { %v229_v1 = vmul.f32 %v226_v55, %v216_v62 }
 0x1e1   :  { %v239_v10 = vadd.f32 %v238_v2, %v237_v0 }
 0x1e2   :  { %v233_v8 = vmul.f32 %v229_v1, %v394_v5 }
 0x1e3   :  { %v240_v4 = vrot.slane %v239_v10, 2 }
 0x1e4   :  { %v244_v12 = vsel %vm33_vm0, %v233_v8, 0.0 }
 0x1e5   :  { %v241_v15 = vadd.f32 %v240_v4, %v239_v10 }
 0x1e7   :  { %v219_v3 = vpop.xlane.xlu1 %218  ;;  %v242_v19 = vrot.slane %v241_v15, 1 }
 0x1e8   :  { %v230_v9 = vmul.f32 %v226_v55, %v219_v3 }
 0x1e9   :  { %v243_v5 = vadd.f32 %v242_v19, %v241_v15 }
 0x1ea   :  { %v234_v11 = vmul.f32 %v230_v9, %v408_v7 }
 0x1ec   :  { %v245_v6 = vsel %vm33_vm0, %v234_v11, 0.0 }
 0x1ed   :  { %v246_v13 = vadd.f32 %v245_v6, %v244_v12 }
 0x1ef   :  { %v247_v14 = vrot.slane %v246_v13, 4 }
 0x1f1   :  { %v248_v16 = vadd.f32 %v247_v14, %v246_v13 }
 0x1f3   :  { %v249_v17 = vrot.slane %v248_v16, 2 }
 0x1f5   :  { %v250_v18 = vadd.f32 %v249_v17, %v248_v16 }
 0x1f7   :  { %v251_v20 = vrot.slane %v250_v18, 1 }
 0x1f9   :  { %v252_v7 = vadd.f32 %v251_v20, %v250_v18 }
 0x1fb   :  { %v256_v21 = vsel %vm255_vm12, %v252_v7, %v243_v5 }
 0x1fc   :  { %259 = vst.msk [vmem:[#allocation2] sm:$0x3] %vm258_vm13, %v256_v21 }
 0x1fd   :  { %270 = dma.vmem_to_hbm [thread:$0]  %s266_s13, 32, %s268_s16, [#allocation3]  }
 0x1fe   :  { %340 = dma.done.wait [#allocation3], 32  }
 0x1ff   :  { %341 = vsyncadd [#allocation3], 4294967264 }
 0x200   :  { %275 = vsyncpa [#allocation3], 1 }

</bundles_post_ra>
